<compile_context>
chip_gen: v6e
topology: v6e:2x2x1
jax: 0.10.0
libtpu: 0.0.40
codegen_flags: <defaults>
</compile_context>

<pallas_src>
import jax
import jax.numpy as jnp
from jax.experimental import pallas as pl
from jax.experimental.pallas import tpu as pltpu

_SMALL_BYTES_THRESHOLD = 1 << 20   # < 1 MiB: skip the kernel entirely.
_CHUNK_THRESHOLD_BYTES = 64 << 20  # >= 64 MiB: concurrent chunked DMAs (v7x).
_MAX_DMA_CHUNKS = 8


# TODO(synk): MAPModel.forward is abstract (nn.Module.forward raises); identity
# pass-through is the only well-defined semantics for the base class.
def _identity_single_dma_kernel(x_hbm_ref, o_hbm_ref, copy_sem):
    """Whole-array identity copy as a single direct HBM->HBM async DMA."""
    cp = pltpu.make_async_copy(x_hbm_ref, o_hbm_ref, copy_sem)
    cp.start()
    cp.wait()


def _identity_alias_kernel(x_hbm_ref, o_hbm_ref):
    """Output buffer aliases the input buffer (input_output_aliases={0: 0});
    no bytes need to move, so the body is intentionally empty."""
    del x_hbm_ref, o_hbm_ref


def _chunk_bounds(dim0, num_chunks):
    """Static (start, size) splits of the leading dim into num_chunks pieces."""
    base, rem = divmod(dim0, num_chunks)
    bounds, start = [], 0
    for i in range(num_chunks):
        size = base + (1 if i < rem else 0)
        bounds.append((start, size))
        start += size
    return bounds


def _make_identity_chunked_kernel(chunk_bounds):
    """Identity copy as len(chunk_bounds) concurrent HBM->HBM DMAs
    (start all, then wait all) — keeps more HBM channels busy on v7x."""

    def kernel(x_hbm_ref, o_hbm_ref, copy_sems):
        copies = []
        for i, (start, size) in enumerate(chunk_bounds):
            cp = pltpu.make_async_copy(
                x_hbm_ref.at[pl.ds(start, size)],
                o_hbm_ref.at[pl.ds(start, size)],
                copy_sems.at[i],
            )
            cp.start()
            copies.append(cp)
        for cp in copies:
            cp.wait()

    return kernel


def map_model_forward(
    x: jax.Array,
    *,
    donate: bool = False,
    small_bytes_threshold: int = _SMALL_BYTES_THRESHOLD,
    chunk_threshold_bytes: int = _CHUNK_THRESHOLD_BYTES,
    max_dma_chunks: int = _MAX_DMA_CHUNKS,
) -> jax.Array:
    """Forward pass of the (abstract) MAPModel: identity pass-through.

    donate=True: alias input to output (zero-copy when XLA can donate the
    input buffer; XLA re-inserts a copy if the caller still needs `x`).
    Otherwise: tiny tensors are returned directly (kernel launch overhead
    dominates); larger tensors are copied with one — or, for very large
    tensors, several concurrent — direct HBM->HBM DMAs (no VMEM staging).
    """
    nbytes = x.size * x.dtype.itemsize
    out_shape = jax.ShapeDtypeStruct(x.shape, x.dtype)

    if donate:
        return pl.pallas_call(
            _identity_alias_kernel,
            out_shape=out_shape,
            in_specs=[pl.BlockSpec(memory_space=pl.ANY)],
            out_specs=pl.BlockSpec(memory_space=pl.ANY),
            input_output_aliases={0: 0},
            cost_estimate=pl.CostEstimate(
                flops=0, transcendentals=0, bytes_accessed=0),
        )(x)

    if nbytes < small_bytes_threshold:
        # Identity of a tiny tensor: the ~us-scale custom-call dispatch would
        # dwarf the copy, so do not launch a kernel at all.
        return x

    cost = pl.CostEstimate(flops=0, transcendentals=0,
                           bytes_accessed=2 * nbytes)

    use_chunks = (
        nbytes >= chunk_threshold_bytes
        and x.ndim >= 1
        and x.shape[0] >= 2
        and max_dma_chunks >= 2
    )

    if not use_chunks:
        # Single HBM->HBM DMA: exactly one HBM read + one HBM write, no VMEM
        # staging (v7x has only 64 MiB VMEM), no vld/vst slots, no tiling.
        return pl.pallas_call(
            _identity_single_dma_kernel,
            out_shape=out_shape,
            in_specs=[pl.BlockSpec(memory_space=pl.ANY)],
            out_specs=pl.BlockSpec(memory_space=pl.ANY),
            scratch_shapes=[pltpu.SemaphoreType.DMA(())],
            cost_estimate=cost,
        )(x)

    # Very large copy: a few concurrent DMAs along the (static) leading dim.
    # Chunks stay multi-MiB so per-descriptor overhead is amortized; the 64 MiB
    # default threshold keeps v5e/v6e-sized copies on the single-DMA path.
    num_chunks = min(max_dma_chunks, x.shape[0])
    bounds = _chunk_bounds(x.shape[0], num_chunks)
    return pl.pallas_call(
        _make_identity_chunked_kernel(bounds),
        out_shape=out_shape,
        in_specs=[pl.BlockSpec(memory_space=pl.ANY)],
        out_specs=pl.BlockSpec(memory_space=pl.ANY),
        scratch_shapes=[pltpu.SemaphoreType.DMA((len(bounds),))],
        cost_estimate=cost,
    )(x)


if __name__ == "__main__":
    key = jax.random.PRNGKey(0)
    # Small NCHW input consistent with a vision-style MAPModel subclass.
    x = jax.random.normal(key, (2, 4, 16, 16), dtype=jnp.float32)

    # 1) Default wrapper path: tiny tensor -> short-circuit, no kernel launch.
    y_fast = jax.block_until_ready(map_model_forward(x))

    # 2) Single-DMA Pallas kernel path (forced by zeroing the size threshold).
    y_dma = jax.block_until_ready(map_model_forward(x, small_bytes_threshold=0))

    # 3) Concurrent chunked-DMA path (thresholds lowered so the small test
    #    tensor exercises the v7x large-copy code path: 4 DMAs of 4 rows each).
    x_big = jax.random.normal(jax.random.PRNGKey(1), (16, 4, 16, 16),
                              dtype=jnp.float32)
    y_chunk = jax.block_until_ready(
        map_model_forward(x_big, small_bytes_threshold=0,
                          chunk_threshold_bytes=1, max_dma_chunks=4))

    # 4) Buffer-donation path (input_output_aliases, zero-copy when legal).
    y_alias = jax.block_until_ready(map_model_forward(x, donate=True))

    for ref_in, out in ((x, y_fast), (x, y_dma), (x_big, y_chunk), (x, y_alias)):
        assert out.shape == ref_in.shape and out.dtype == ref_in.dtype
        assert bool(jnp.array_equal(out, ref_in))

    print("KERNEL_OK")
</pallas_src>

<mosaic_0001>
module attributes {stable_mosaic.version = 11 : i64} {
  func.func @_identity_single_dma_kernel(%arg0: memref<2x4x16x16xf32, #tpu.memory_space<any>>, %arg1: memref<2x4x16x16xf32, #tpu.memory_space<any>>, %arg2: memref<!tpu.dma_semaphore, #tpu.memory_space<semaphore_mem>>) attributes {dimension_semantics = [], scalar_prefetch = 0 : i64, scratch_operands = 1 : i64, tpu.core_type = #tpu.core_type<tc>} {
    tpu.enqueue_dma source(%arg0 : memref<2x4x16x16xf32, #tpu.memory_space<any>>) target(%arg1 : memref<2x4x16x16xf32, #tpu.memory_space<any>>) target_semaphore(%arg2 : memref<!tpu.dma_semaphore, #tpu.memory_space<semaphore_mem>>)
    tpu.wait_dma2 semaphore(%arg2 : memref<!tpu.dma_semaphore, #tpu.memory_space<semaphore_mem>>) src(%arg0 : memref<2x4x16x16xf32, #tpu.memory_space<any>>) dst(%arg1 : memref<2x4x16x16xf32, #tpu.memory_space<any>>)
    return
  }
}

</mosaic_0001>

<bundles_post_ra>
// kernel: tpu_custom_call.1
= control target key start
LH: loop header
LB: loop body
LE: loop exit
PB: predicated region body
PF: predicated region fallthrough
CT: control target
= control target key end

     0   :  { %s30_s6 = smov [#allocation2]   ;;  %s31_s7 = smov 131072   ;;  %s49_s0 = inlined_call_operand.hbm [shape: f32[2,4,16,16], index: 0, kind: input, shape index: {}]   ;;  %s50_s1 = inlined_call_operand.hbm [shape: f32[2,4,16,16], index: 1, kind: output, shape index: {}]  }
   0x1   :  { %s32_s8 = smov 0  }
   0x2   :  { %12 = dma.general %s49_s0, 2048, %s50_s1, %s30_s6, %s31_s7, [#allocation4], %s32_s8, 0  }
   0x3   :  { %28 = dma.done.wait [#allocation2], 2048 }
   0x4   :  { %29 = vsyncadd [#allocation2], 4294965248 }
   0x5   :  { %18 = vsyncmov [#allocation2] }
   0x8   :  { %s19_s13 = vpop.sfrf %18 }
   0x9   :  { %p24_p0 = scmp.ne.s32.totalorder %s19_s13, 0 }
   0xb   :  { %23 = shalt.err (%p24_p0)  }

</bundles_post_ra>
